<compile_context>
chip_gen: v6e
topology: v6e:2x2x1
jax: 0.10.0
libtpu: 0.0.40
codegen_flags: <defaults>
</compile_context>

<pallas_src>
import functools

import jax
import jax.numpy as jnp
from jax.experimental import pallas as pl
from jax.experimental.pallas import tpu as pltpu

_LANE = 128  # TPU vreg lane width


def _round_up(x: int, m: int) -> int:
    return (x + m - 1) // m * m


def _fused_mlp_kernel(*refs, num_layers: int):
    """refs = (x_ref, w0, b0, w1, b1, ..., w_{L-1}, b_{L-1}, o_ref).

    Chains num_layers dense layers entirely in vregs:
      hidden layers:  h = relu(h @ W_i + b_i)
      output layer:   h = h @ W_out + b_out          (no activation)
    Weights arrive already in the compute dtype (bf16 or f32); accumulation
    is always f32 (preferred_element_type), bias-add / ReLU stay f32.
    """
    x_ref = refs[0]
    o_ref = refs[-1]
    wb = refs[1:-1]

    h = x_ref[...]  # f32 [TB, F]
    for i in range(num_layers):
        w = wb[2 * i][...]       # [fin, fout], pre-cast compute dtype
        b = wb[2 * i + 1][...]   # [1, fout], f32
        y = jnp.dot(h.astype(w.dtype), w, preferred_element_type=jnp.float32)
        y = y + b
        if i < num_layers - 1:
            y = jnp.maximum(y, 0.0)  # ReLU on hidden layers only
        h = y
    o_ref[...] = h.astype(o_ref.dtype)


def prepare_params(params, compute_dtype=jnp.bfloat16):
    """One-time (outside the jit path) parameter preparation.

    * Zero-pads the output layer's columns to a lane-dense 128 width so the
      kernel's final store is an unmasked vst.
    * Pre-casts weights to the MXU-native compute dtype in HBM (halves weight
      DMA bytes and removes in-kernel VPU casts); biases stay f32.

    params: list of (w, b) with w: [fin, fout], b: [1, fout]; last entry is
            the output layer.
    Returns (flat_wb_tuple, num_classes).
    """
    num_classes = params[-1][0].shape[1]
    fout_pad = _round_up(num_classes, _LANE)

    w_out, b_out = params[-1]
    w_out_p = jnp.zeros((w_out.shape[0], fout_pad), jnp.float32)
    w_out_p = w_out_p.at[:, :num_classes].set(w_out)
    b_out_p = jnp.zeros((1, fout_pad), jnp.float32)
    b_out_p = b_out_p.at[:, :num_classes].set(b_out)

    flat = []
    for w, b in params[:-1]:
        flat += [w.astype(compute_dtype), b.astype(jnp.float32)]
    flat += [w_out_p.astype(compute_dtype), b_out_p.astype(jnp.float32)]
    # Materialize once so no pad/cast ops remain in the per-call trace.
    return tuple(jax.block_until_ready(jnp.asarray(a)) for a in flat), num_classes


@functools.partial(jax.jit, static_argnames=("num_classes", "block_batch"))
def _forward_impl(x, flat_wb, *, num_classes, block_batch):
    B, F = x.shape
    num_layers = len(flat_wb) // 2
    fout_pad = flat_wb[-2].shape[1]

    # Batch tile: 128 saturates v5e's MXU; 256 fills v6e/v7x's 256-row MXUs.
    TB = min(block_batch, B)
    B_pad = _round_up(B, TB)
    if B_pad != B:
        x = jnp.pad(x, ((0, B_pad - B), (0, 0)))
    grid = (B_pad // TB,)

    # Weights/biases: full-block, constant index_map -> DMA'd once, resident
    # in VMEM across grid steps.
    wb_specs = [pl.BlockSpec(a.shape, lambda i: (0, 0)) for a in flat_wb]

    out_padded = pl.pallas_call(
        functools.partial(_fused_mlp_kernel, num_layers=num_layers),
        out_shape=jax.ShapeDtypeStruct((B_pad, fout_pad), jnp.float32),
        grid=grid,
        in_specs=[pl.BlockSpec((TB, F), lambda i: (i, 0))] + wb_specs,
        out_specs=pl.BlockSpec((TB, fout_pad), lambda i: (i, 0)),
        compiler_params=pltpu.CompilerParams(
            dimension_semantics=("parallel",)),  # both TCs on v7x
    )(x, *flat_wb)

    # NOTE: if the consumer can work on padded logits (or wants argmax/softmax
    # fused), defer/remove this slice to save one HBM round trip per call.
    return out_padded[:B, :num_classes]


def mlp_classifier_forward(x, prepared_wb, num_classes, *, block_batch=128):
    """Matches MlpClassifierNet.forward: logits [B, num_classes]."""
    return _forward_impl(x, prepared_wb, num_classes=num_classes,
                         block_batch=block_batch)


def init_params(key, num_features, num_hidden_layers, num_neurons, num_classes):
    """Deterministic init mirroring nn.Linear's U(-1/sqrt(fan_in), 1/sqrt(fan_in))."""
    dims = [num_features] + [num_neurons] * num_hidden_layers + [num_classes]
    params = []
    for fan_in, fan_out in zip(dims[:-1], dims[1:]):
        key, wk, bk = jax.random.split(key, 3)
        bound = 1.0 / (fan_in ** 0.5)
        w = jax.random.uniform(wk, (fan_in, fan_out), jnp.float32, -bound, bound)
        b = jax.random.uniform(bk, (1, fan_out), jnp.float32, -bound, bound)
        params.append((w, b))
    return params


if __name__ == "__main__":
    # Iris-like configuration: 4 features, 3 classes, 2 hidden layers of 32
    # neurons.  Batch 256 with TB=128 -> grid=(2,), exercising the parallel
    # batch axis (and v7x's second TensorCore) while staying tiny.
    num_features = 4
    num_hidden_layers = 2
    num_neurons = 32
    num_classes = 3
    batch = 256

    key = jax.random.PRNGKey(0)
    key, xk = jax.random.split(key)
    x = jax.random.normal(xk, (batch, num_features), dtype=jnp.float32)

    params = init_params(key, num_features, num_hidden_layers, num_neurons,
                         num_classes)

    # Plain-JAX f32 reference.
    ref = x
    for w, b in params[:-1]:
        ref = jnp.maximum(ref @ w + b, 0.0)
    ref = ref @ params[-1][0] + params[-1][1]

    # bf16 compute path (default: MXU-native on v5e/v6e/v7x, f32 accumulation).
    wb_bf16, nc = prepare_params(params, compute_dtype=jnp.bfloat16)
    logits_bf16 = mlp_classifier_forward(x, wb_bf16, nc, block_batch=128)
    jax.block_until_ready(logits_bf16)
    assert logits_bf16.shape == (batch, num_classes)
    assert jnp.allclose(logits_bf16, ref, atol=3e-2, rtol=3e-2)

    # f32 compute path (exactness check).
    wb_f32, nc32 = prepare_params(params, compute_dtype=jnp.float32)
    logits_f32 = mlp_classifier_forward(x, wb_f32, nc32, block_batch=128)
    jax.block_until_ready(logits_f32)
    assert logits_f32.shape == (batch, num_classes)
    assert jnp.allclose(logits_f32, ref, atol=1e-5, rtol=1e-5)

    print("KERNEL_OK")
</pallas_src>

<mosaic_0001>
module attributes {stable_mosaic.version = 11 : i64} {
  func.func @_fused_mlp_kernel(%arg0: i32, %arg1: memref<128x4xf32, #tpu.memory_space<vmem>>, %arg2: memref<4x32xbf16, #tpu.memory_space<vmem>>, %arg3: memref<1x32xf32, #tpu.memory_space<vmem>>, %arg4: memref<32x32xbf16, #tpu.memory_space<vmem>>, %arg5: memref<1x32xf32, #tpu.memory_space<vmem>>, %arg6: memref<32x128xbf16, #tpu.memory_space<vmem>>, %arg7: memref<1x128xf32, #tpu.memory_space<vmem>>, %arg8: memref<128x128xf32, #tpu.memory_space<vmem>>) attributes {dimension_semantics = [#tpu.dimension_semantics<parallel>], iteration_bounds = array<i64: 2>, scalar_prefetch = 0 : i64, scratch_operands = 0 : i64, tpu.core_type = #tpu.core_type<tc>, window_params = [{transform_indices = @transform_0, window_bounds = array<i64: 128, 4>}, {pipeline_mode = #tpu.pipeline_mode<synchronous>, transform_indices = @transform_1, window_bounds = array<i64: 4, 32>}, {pipeline_mode = #tpu.pipeline_mode<synchronous>, transform_indices = @transform_2, window_bounds = array<i64: 1, 32>}, {pipeline_mode = #tpu.pipeline_mode<synchronous>, transform_indices = @transform_3, window_bounds = array<i64: 32, 32>}, {pipeline_mode = #tpu.pipeline_mode<synchronous>, transform_indices = @transform_4, window_bounds = array<i64: 1, 32>}, {pipeline_mode = #tpu.pipeline_mode<synchronous>, transform_indices = @transform_5, window_bounds = array<i64: 32, 128>}, {pipeline_mode = #tpu.pipeline_mode<synchronous>, transform_indices = @transform_6, window_bounds = array<i64: 1, 128>}, {transform_indices = @transform_7, window_bounds = array<i64: 128, 128>}]} {
    %c0 = arith.constant 0 : index
    %c0_0 = arith.constant 0 : index
    %0 = vector.load %arg1[%c0, %c0_0] : memref<128x4xf32, #tpu.memory_space<vmem>>, vector<128x4xf32>
    %c0_1 = arith.constant 0 : index
    %c0_2 = arith.constant 0 : index
    %1 = vector.load %arg2[%c0_1, %c0_2] : memref<4x32xbf16, #tpu.memory_space<vmem>>, vector<4x32xbf16>
    %c0_3 = arith.constant 0 : index
    %c0_4 = arith.constant 0 : index
    %2 = vector.load %arg3[%c0_3, %c0_4] : memref<1x32xf32, #tpu.memory_space<vmem>>, vector<1x32xf32>
    %3 = arith.truncf %0 : vector<128x4xf32> to vector<128x4xbf16>
    %cst = arith.constant dense<0.000000e+00> : vector<128x32xf32>
    %4 = tpu.matmul %3, %1, %cst {dimension_numbers = #tpu.dot_dimension_numbers<[1], [0], [0], [1], [0, 0, 1, 1], [], []>} : vector<128x4xbf16>, vector<4x32xbf16>, vector<128x32xf32> -> vector<128x32xf32>
    %5 = vector.broadcast %2 : vector<1x32xf32> to vector<128x32xf32>
    %6 = arith.addf %4, %5 : vector<128x32xf32>
    %cst_5 = arith.constant 0.000000e+00 : f32
    %7 = vector.broadcast %cst_5 : f32 to vector<128x32xf32>
    %8 = arith.maximumf %6, %7 : vector<128x32xf32>
    %c0_6 = arith.constant 0 : index
    %c0_7 = arith.constant 0 : index
    %9 = vector.load %arg4[%c0_6, %c0_7] : memref<32x32xbf16, #tpu.memory_space<vmem>>, vector<32x32xbf16>
    %c0_8 = arith.constant 0 : index
    %c0_9 = arith.constant 0 : index
    %10 = vector.load %arg5[%c0_8, %c0_9] : memref<1x32xf32, #tpu.memory_space<vmem>>, vector<1x32xf32>
    %11 = arith.truncf %8 : vector<128x32xf32> to vector<128x32xbf16>
    %cst_10 = arith.constant dense<0.000000e+00> : vector<128x32xf32>
    %12 = tpu.matmul %11, %9, %cst_10 {dimension_numbers = #tpu.dot_dimension_numbers<[1], [0], [0], [1], [0, 0, 1, 1], [], []>} : vector<128x32xbf16>, vector<32x32xbf16>, vector<128x32xf32> -> vector<128x32xf32>
    %13 = vector.broadcast %10 : vector<1x32xf32> to vector<128x32xf32>
    %14 = arith.addf %12, %13 : vector<128x32xf32>
    %cst_11 = arith.constant 0.000000e+00 : f32
    %15 = vector.broadcast %cst_11 : f32 to vector<128x32xf32>
    %16 = arith.maximumf %14, %15 : vector<128x32xf32>
    %c0_12 = arith.constant 0 : index
    %c0_13 = arith.constant 0 : index
    %17 = vector.load %arg6[%c0_12, %c0_13] : memref<32x128xbf16, #tpu.memory_space<vmem>>, vector<32x128xbf16>
    %c0_14 = arith.constant 0 : index
    %c0_15 = arith.constant 0 : index
    %18 = vector.load %arg7[%c0_14, %c0_15] : memref<1x128xf32, #tpu.memory_space<vmem>>, vector<1x128xf32>
    %19 = arith.truncf %16 : vector<128x32xf32> to vector<128x32xbf16>
    %cst_16 = arith.constant dense<0.000000e+00> : vector<128x128xf32>
    %20 = tpu.matmul %19, %17, %cst_16 {dimension_numbers = #tpu.dot_dimension_numbers<[1], [0], [0], [1], [0, 0, 1, 1], [], []>} : vector<128x32xbf16>, vector<32x128xbf16>, vector<128x128xf32> -> vector<128x128xf32>
    %21 = vector.broadcast %18 : vector<1x128xf32> to vector<128x128xf32>
    %22 = arith.addf %20, %21 : vector<128x128xf32>
    %c0_17 = arith.constant 0 : index
    %c0_18 = arith.constant 0 : index
    %23 = vector.load %arg8[%c0_17, %c0_18] : memref<128x128xf32, #tpu.memory_space<vmem>>, vector<128x128xf32>
    tpu.vector_store %arg8[%c0_17, %c0_18], %22 {strides = array<i32>} : memref<128x128xf32, #tpu.memory_space<vmem>>, vector<128x128xf32>,
    return
  }
  func.func @transform_0(%arg0: i32) -> (i32, i32) {
    %c0_i32 = arith.constant 0 : i32
    %c0_i32_0 = arith.constant 0 : i32
    return %arg0, %c0_i32 : i32, i32
  }
  func.func @transform_1(%arg0: i32) -> (i32, i32) {
    %c0_i32 = arith.constant 0 : i32
    %c0_i32_0 = arith.constant 0 : i32
    %c0_i32_1 = arith.constant 0 : i32
    return %c0_i32, %c0_i32_0 : i32, i32
  }
  func.func @transform_2(%arg0: i32) -> (i32, i32) {
    %c0_i32 = arith.constant 0 : i32
    %c0_i32_0 = arith.constant 0 : i32
    %c0_i32_1 = arith.constant 0 : i32
    return %c0_i32, %c0_i32_0 : i32, i32
  }
  func.func @transform_3(%arg0: i32) -> (i32, i32) {
    %c0_i32 = arith.constant 0 : i32
    %c0_i32_0 = arith.constant 0 : i32
    %c0_i32_1 = arith.constant 0 : i32
    return %c0_i32, %c0_i32_0 : i32, i32
  }
  func.func @transform_4(%arg0: i32) -> (i32, i32) {
    %c0_i32 = arith.constant 0 : i32
    %c0_i32_0 = arith.constant 0 : i32
    %c0_i32_1 = arith.constant 0 : i32
    return %c0_i32, %c0_i32_0 : i32, i32
  }
  func.func @transform_5(%arg0: i32) -> (i32, i32) {
    %c0_i32 = arith.constant 0 : i32
    %c0_i32_0 = arith.constant 0 : i32
    %c0_i32_1 = arith.constant 0 : i32
    return %c0_i32, %c0_i32_0 : i32, i32
  }
  func.func @transform_6(%arg0: i32) -> (i32, i32) {
    %c0_i32 = arith.constant 0 : i32
    %c0_i32_0 = arith.constant 0 : i32
    %c0_i32_1 = arith.constant 0 : i32
    return %c0_i32, %c0_i32_0 : i32, i32
  }
  func.func @transform_7(%arg0: i32) -> (i32, i32) {
    %c0_i32 = arith.constant 0 : i32
    %c0_i32_0 = arith.constant 0 : i32
    return %arg0, %c0_i32 : i32, i32
  }
}

</mosaic_0001>

<bundles_post_ra>
// kernel: _forward_impl.1
= control target key start
LH: loop header
LB: loop body
LE: loop exit
PB: predicated region body
PF: predicated region fallthrough
CT: control target
= control target key end

     0   :  { %s1043_s24 = smov 0   ;;  %s1133_s0 = inlined_call_operand.vmem [shape: f32[256,4], index: 0, kind: input, shape index: {}]   ;;  %s1134_s1 = inlined_call_operand.vmem [shape: bf16[4,32], index: 1, kind: input, shape index: {}]   ;;  %s1135_s2 = inlined_call_operand.vmem [shape: f32[1,32], index: 2, kind: input, shape index: {}]   ;;  %s1136_s3 = inlined_call_operand.vmem [shape: bf16[32,32], index: 3, kind: input, shape index: {}]   ;;  %s1137_s4 = inlined_call_operand.vmem [shape: f32[1,32], index: 4, kind: input, shape index: {}]   ;;  %s1138_s5 = inlined_call_operand.vmem [shape: bf16[32,128], index: 5, kind: input, shape index: {}]   ;;  %s1139_s6 = inlined_call_operand.vmem [shape: f32[1,128], index: 6, kind: input, shape index: {}]   ;;  %s1140_s7 = inlined_call_operand.vmem [shape: f32[256,128], index: 7, kind: output, shape index: {}]  }
   0x1 LB: > { %s850_s25 = sadd.s32 4294967295, %s1001_s24   ;;  %p854_p0 = scmp.ge.s32.totalorder %s1001_s24, 1  ;;  %s1001_s24 = sphi %s1043_s24, %s17_s24  }
   0x2   : > { %p238_p1 = scmp.lt.s32.totalorder %s1001_s24, 3 }
   0x4   : > { %p239_p2 = pnand %p854_p0, %p238_p1 }
   0x5   : > { %s855_s28 = sshll.u32 (!%p239_p2), %s850_s25, 4 }
   0x6   : > { %242 = sbr.rel (%p239_p2) target bundleno = 656 (0x290), region = 48  ;;  %p271_p3 = scmp.lt.s32.totalorder (!%p239_p2), %s855_s28, 31 }
   0xb   : > { %v299_v0 = vld [vmem:[%s1134_s1] sm:$0x3]  ;;  %vm340_vm0 = vcmask 1041408   ;;  %v991_v1 = vld [vmem:[%s1136_s3 + $0x8] sm:$0xff]   ;;  %s1142_s28 = smov (!%p271_p3, %s855_s28), 31  ;;  %vm315_vm1 = vcmask 31744  }
   0xc   : > { %981 = vmatprep.subr.msk.bf16.mxu0 %vm340_vm0, %v299_v0  ;;  %v342_v2 = vsel %vm340_vm0, %v299_v0, 0  ;;  %982 = vmatprep.subr.msk.bf16.mxu1 %vm340_vm0, %v299_v0  ;;  %s856_s8 = sshll.u32 %s1142_s28, 3  ;;  %v992_v27 = vld [vmem:[%s1136_s3] sm:$0xff]   ;;  %v993_v28 = vld [vmem:[%s1138_s5 + $0x8] sm:$0xff]   ;;  %vm488_vm2 = vcmask 261120  }
   0xd   : > { %922 = vmatpush3.bf16.msra.mxu0 %v342_v2  ;;  %980 = vmatpush3.bf16.msra.mxu1 %v342_v2  ;;  %s274_s11 = scalar_lea.vmem %s1133_s0, %s856_s8  ;;  %v859_v31 = vld [vmem:[%s1135_s2] ss:$0 sm:$0xff]  ;;  %s1112_s27 = scalar_lea.vmem %s1140_s7, %s856_s8 }
   0xe   : > { %939 = vmatprep.subr.bf16.mxu1 %v991_v1  ;;  %v283_v3 = vld [vmem:[%s274_s11] sm:$0xff]  ;;  %v284_v4 = vld [vmem:[%s274_s11 + $0x8] sm:$0xff]  ;;  %v285_v5 = vld [vmem:[%s274_s11 + $0x10] sm:$0xff]  ;;  %959 = vmatprep.subr.bf16.mxu0 %v993_v28 }
   0xf   : > { %v301_v6 = vpack.c.bf16 %v284_v4, %v283_v3  ;;  %v286_v7 = vld [vmem:[%s274_s11 + $0x18] sm:$0xff]  ;;  %v287_v8 = vld [vmem:[%s274_s11 + $0x20] sm:$0xff]  ;;  %v288_v9 = vld [vmem:[%s274_s11 + $0x28] sm:$0xff] }
  0x10   : > { %v302_v10 = vpack.c.bf16 %v286_v7, %v285_v5  ;;  %v303_v11 = vpack.c.bf16 %v288_v9, %v287_v8  ;;  %v291_v12 = vld [vmem:[%s274_s11 + $0x40] sm:$0xff]  ;;  %v292_v13 = vld [vmem:[%s274_s11 + $0x48] sm:$0xff]  ;;  %v293_v14 = vld [vmem:[%s274_s11 + $0x50] sm:$0xff] }
  0x11   : > { %923 = vmatprep.mubr.msk.bf16.mxu0 %vm315_vm1, %v301_v6  ;;  %v294_v15 = vld [vmem:[%s274_s11 + $0x58] sm:$0xff]  ;;  %v305_v16 = vpack.c.bf16 %v292_v13, %v291_v12  ;;  %v295_v18 = vld [vmem:[%s274_s11 + $0x60] sm:$0xff]  ;;  %v296_v19 = vld [vmem:[%s274_s11 + $0x68] sm:$0xff] }
  0x12   : > { %924 = vmatmul.mubr.msk.bf16.vlgmr.msra.gmra.mxu0 %vm315_vm1, %v302_v10  ;;  %v306_v17 = vpack.c.bf16 %v294_v15, %v293_v14  ;;  %v289_v20 = vld [vmem:[%s274_s11 + $0x30] sm:$0xff]  ;;  %v290_v21 = vld [vmem:[%s274_s11 + $0x38] sm:$0xff]  ;;  %v307_v22 = vpack.c.bf16 %v296_v19, %v295_v18 }
  0x13   : > { %927 = vmatprep.mubr.msk.bf16.mxu0 %vm315_vm1, %v303_v11  ;;  %931 = vmatprep.mubr.msk.bf16.mxu1 %vm315_vm1, %v305_v16  ;;  %v304_v23 = vpack.c.bf16 %v290_v21, %v289_v20  ;;  %v297_v24 = vld [vmem:[%s274_s11 + $0x70] sm:$0xff]  ;;  %v298_v25 = vld [vmem:[%s274_s11 + $0x78] sm:$0xff] }
  0x14   : > { %932 = vmatmul.mubr.msk.bf16.vlgmr.msra.gmra.mxu1 %vm315_vm1, %v306_v17  ;;  %v308_v26 = vpack.c.bf16 %v298_v25, %v297_v24  ;;  %960 = vmatpush3.bf16.msra.mxu0 %v993_v28  ;;  %v868_v25 = vld [vmem:[%s1137_s4] ss:$0 sm:$0xff] }
  0x15   : > { %935 = vmatprep.mubr.msk.bf16.mxu1 %vm315_vm1, %v307_v22  ;;  %940 = vmatpush3.bf16.msra.mxu1 %v991_v1  ;;  %v994_v22 = vld [vmem:[%s1138_s5] sm:$0xff]  }
  0x16   : > { %941 = vmatprep.subr.bf16.mxu1 %v992_v27  ;;  %961 = vmatprep.subr.bf16.mxu0 %v994_v22 }
  0x18   : > { %962 = vmatpush3.bf16.msra.mxu0 %v994_v22 }
  0x19   : > { %942 = vmatpush3.bf16.msra.mxu1 %v992_v27 }
  0x1a   : > { %928 = vmatmul.mubr.msk.bf16.gmra.mxu0 %vm315_vm1, %v304_v23 }
  0x1c   : > { %936 = vmatmul.mubr.msk.bf16.gmra.mxu1 %vm315_vm1, %v308_v26 }
  0xd2   : > { %v925_v29 = vpop.f32.mrf.mxu0 }
  0xd3   : > { %v387_v37 = vadd.f32 %v925_v29, %v859_v31 }
  0xd4   : > { %v378_v30 = vpop.f32.mrf.mxu0  ;;  %v933_v32 = vpop.f32.mrf.mxu1 }
  0xd5   : > { %v379_v34 = vadd.f32 %v859_v31, %v378_v30  ;;  %v443_v46 = vmax.f32 %v387_v37, 0.0  ;;  %v419_v8 = vadd.f32 %v933_v32, %v859_v31 }
  0xd6   : > { %v926_v33 = vpop.f32.mrf.mxu0  ;;  %v410_v36 = vpop.f32.mrf.mxu1 }
  0xd7   : > { %v390_v35 = vadd.f32 %v926_v33, %v859_v31  ;;  %v441_v43 = vmax.f32 %v379_v34, 0.0  ;;  %v411_v49 = vadd.f32 %v859_v31, %v410_v36  ;;  %v451_v13 = vmax.f32 %v419_v8, 0.0 }
  0xd8   : > { %v381_v38 = vpop.f32.mrf.mxu0  ;;  %v934_v40 = vpop.f32.mrf.mxu1 }
  0xd9   : > { %v382_v39 = vadd.f32 %v859_v31, %v381_v38  ;;  %v444_v41 = vmax.f32 %v390_v35, 0.0  ;;  %v449_v59 = vmax.f32 %v411_v49, 0.0  ;;  %v422_v10 = vadd.f32 %v934_v40, %v859_v31 }
  0xda   : > { %v929_v42 = vpop.f32.mrf.mxu0  ;;  %v413_v45 = vpop.f32.mrf.mxu1 }
  0xdb   : > { %v442_v44 = vmax.f32 %v382_v39, 0.0  ;;  %v414_v50 = vadd.f32 %v859_v31, %v413_v45  ;;  %v463_v52 = vpack.c.bf16 %v444_v41, %v443_v46  ;;  %v403_v57 = vadd.f32 %v929_v42, %v859_v31 }
  0xdc   : > { %v394_v47 = vpop.f32.mrf.mxu0  ;;  %v937_v51 = vpop.f32.mrf.mxu1  ;;  %v452_v14 = vmax.f32 %v422_v10, 0.0 }
  0xdd   : > { %v462_v48 = vpack.c.bf16 %v442_v44, %v441_v43  ;;  %v395_v54 = vadd.f32 %v859_v31, %v394_v47  ;;  %v450_v61 = vmax.f32 %v414_v50, 0.0  ;;  %v447_v3 = vmax.f32 %v403_v57, 0.0 }
  0xde   : > { %v930_v53 = vpop.f32.mrf.mxu0  ;;  %v426_v56 = vpop.f32.mrf.mxu1  ;;  %v467_v16 = vpack.c.bf16 %v452_v14, %v451_v13  ;;  %v435_v17 = vadd.f32 %v937_v51, %v859_v31 }
  0xdf   : > { %v406_v55 = vadd.f32 %v930_v53, %v859_v31  ;;  %943 = vmatprep.mubr.msk.bf16.mxu1 %vm488_vm2, %v462_v48  ;;  %v445_v0 = vmax.f32 %v395_v54, 0.0  ;;  %v466_v5 = vpack.c.bf16 %v450_v61, %v449_v59  ;;  %v427_v6 = vadd.f32 %v859_v31, %v426_v56 }
  0xe0   : > { %v397_v58 = vpop.f32.mrf.mxu0  ;;  %944 = vmatmul.mubr.msk.bf16.vlgmr.msra.gmra.mxu1 %vm488_vm2, %v463_v52  ;;  %v938_v62 = vpop.f32.mrf.mxu1  ;;  %v455_v19 = vmax.f32 %v435_v17, 0.0 }
  0xe1   : > { %v398_v60 = vadd.f32 %v859_v31, %v397_v58  ;;  %v448_v63 = vmax.f32 %v406_v55, 0.0  ;;  %v453_v11 = vmax.f32 %v427_v6, 0.0  ;;  %v438_v18 = vadd.f32 %v938_v62, %v859_v31 }
  0xe2   : > { %v429_v2 = vpop.f32.mrf.mxu1 }
  0xe3   : > { %v446_v1 = vmax.f32 %v398_v60, 0.0  ;;  %v430_v7 = vadd.f32 %v859_v31, %v429_v2  ;;  %v465_v9 = vpack.c.bf16 %v448_v63, %v447_v3  ;;  %v456_v20 = vmax.f32 %v438_v18, 0.0 }
  0xe5   : > { %v464_v4 = vpack.c.bf16 %v446_v1, %v445_v0  ;;  %v454_v12 = vmax.f32 %v430_v7, 0.0  ;;  %v469_v21 = vpack.c.bf16 %v456_v20, %v455_v19 }
  0xe7   : > { %947 = vmatprep.mubr.msk.bf16.mxu1 %vm488_vm2, %v464_v4  ;;  %v468_v15 = vpack.c.bf16 %v454_v12, %v453_v11 }
  0xe8   : > { %948 = vmatmul.mubr.msk.bf16.gmra.mxu1 %vm488_vm2, %v465_v9 }
  0xe9   : > { %951 = vmatprep.mubr.msk.bf16.mxu1 %vm488_vm2, %v466_v5 }
  0xf0   : > { %952 = vmatmul.mubr.msk.bf16.gmra.mxu1 %vm488_vm2, %v467_v16  ;;  %v879_v16 = vld [vmem:[%s1139_s6] ss:$0 sm:$0xff] }
  0xf1   : > { %955 = vmatprep.mubr.msk.bf16.mxu1 %vm488_vm2, %v468_v15 }
  0xf8   : > { %956 = vmatmul.mubr.msk.bf16.gmra.mxu1 %vm488_vm2, %v469_v21 }
 0x1a0   : > { %v945_v23 = vpop.f32.mrf.mxu1 }
 0x1a1   : > { %v556_v29 = vadd.f32 %v945_v23, %v868_v25 }
 0x1a2   : > { %v547_v24 = vpop.f32.mrf.mxu1 }
 0x1a3   : > { %v548_v27 = vadd.f32 %v868_v25, %v547_v24  ;;  %v612_v36 = vmax.f32 %v556_v29, 0.0 }
 0x1a4   : > { %v946_v26 = vpop.f32.mrf.mxu1 }
 0x1a5   : > { %v559_v28 = vadd.f32 %v946_v26, %v868_v25  ;;  %v610_v34 = vmax.f32 %v548_v27, 0.0 }
 0x1a6   : > { %v550_v30 = vpop.f32.mrf.mxu1 }
 0x1a7   : > { %v551_v31 = vadd.f32 %v868_v25, %v550_v30  ;;  %v613_v32 = vmax.f32 %v559_v28, 0.0 }
 0x1a8   : > { %v949_v33 = vpop.f32.mrf.mxu1 }
 0x1a9   : > { %v611_v35 = vmax.f32 %v551_v31, 0.0  ;;  %v632_v39 = vpack.c.bf16 %v613_v32, %v612_v36  ;;  %v572_v43 = vadd.f32 %v949_v33, %v868_v25 }
 0x1aa   : > { %v563_v37 = vpop.f32.mrf.mxu1 }
 0x1ab   : > { %v631_v38 = vpack.c.bf16 %v611_v35, %v610_v34  ;;  %v564_v41 = vadd.f32 %v868_v25, %v563_v37  ;;  %v616_v50 = vmax.f32 %v572_v43, 0.0 }
 0x1ac   : > { %v950_v40 = vpop.f32.mrf.mxu1 }
 0x1ad   : > { %v575_v42 = vadd.f32 %v950_v40, %v868_v25  ;;  %963 = vmatprep.mubr.msk.bf16.mxu0 %vm488_vm2, %v631_v38  ;;  %v614_v48 = vmax.f32 %v564_v41, 0.0 }
 0x1ae   : > { %v566_v44 = vpop.f32.mrf.mxu1  ;;  %964 = vmatmul.mubr.msk.bf16.vlgmr.msra.gmra.mxu0 %vm488_vm2, %v632_v39 }
 0x1af   : > { %v567_v45 = vadd.f32 %v868_v25, %v566_v44  ;;  %v617_v46 = vmax.f32 %v575_v42, 0.0 }
 0x1b0   : > { %v953_v47 = vpop.f32.mrf.mxu1 }
 0x1b1   : > { %v615_v49 = vmax.f32 %v567_v45, 0.0  ;;  %v634_v53 = vpack.c.bf16 %v617_v46, %v616_v50  ;;  %v588_v57 = vadd.f32 %v953_v47, %v868_v25 }
 0x1b2   : > { %v579_v51 = vpop.f32.mrf.mxu1 }
 0x1b3   : > { %v633_v52 = vpack.c.bf16 %v615_v49, %v614_v48  ;;  %v580_v55 = vadd.f32 %v868_v25, %v579_v51  ;;  %v620_v0 = vmax.f32 %v588_v57, 0.0 }
 0x1b4   : > { %v954_v54 = vpop.f32.mrf.mxu1 }
 0x1b5   : > { %v591_v56 = vadd.f32 %v954_v54, %v868_v25  ;;  %967 = vmatprep.mubr.msk.bf16.mxu0 %vm488_vm2, %v633_v52  ;;  %v618_v62 = vmax.f32 %v580_v55, 0.0 }
 0x1b6   : > { %v582_v58 = vpop.f32.mrf.mxu1  ;;  %968 = vmatmul.mubr.msk.bf16.gmra.mxu0 %vm488_vm2, %v634_v53 }
 0x1b7   : > { %v583_v59 = vadd.f32 %v868_v25, %v582_v58  ;;  %v621_v60 = vmax.f32 %v591_v56, 0.0 }
 0x1b8   : > { %v957_v61 = vpop.f32.mrf.mxu1 }
 0x1b9   : > { %v619_v63 = vmax.f32 %v583_v59, 0.0  ;;  %v636_v3 = vpack.c.bf16 %v621_v60, %v620_v0  ;;  %v604_v7 = vadd.f32 %v957_v61, %v868_v25 }
 0x1ba   : > { %v595_v1 = vpop.f32.mrf.mxu1 }
 0x1bb   : > { %v635_v2 = vpack.c.bf16 %v619_v63, %v618_v62  ;;  %v596_v5 = vadd.f32 %v868_v25, %v595_v1  ;;  %v624_v13 = vmax.f32 %v604_v7, 0.0 }
 0x1bc   : > { %v958_v4 = vpop.f32.mrf.mxu1 }
 0x1bd   : > { %v607_v6 = vadd.f32 %v958_v4, %v868_v25  ;;  %971 = vmatprep.mubr.msk.bf16.mxu0 %vm488_vm2, %v635_v2  ;;  %v622_v11 = vmax.f32 %v596_v5, 0.0 }
 0x1be   : > { %v598_v8 = vpop.f32.mrf.mxu1  ;;  %972 = vmatmul.mubr.msk.bf16.gmra.mxu0 %vm488_vm2, %v636_v3 }
 0x1bf   : > { %v599_v9 = vadd.f32 %v868_v25, %v598_v8  ;;  %v625_v10 = vmax.f32 %v607_v6, 0.0 }
 0x1c1   : > { %v623_v12 = vmax.f32 %v599_v9, 0.0  ;;  %v638_v15 = vpack.c.bf16 %v625_v10, %v624_v13 }
 0x1c3   : > { %v637_v14 = vpack.c.bf16 %v623_v12, %v622_v11 }
 0x1c5   : > { %975 = vmatprep.mubr.msk.bf16.mxu0 %vm488_vm2, %v637_v14 }
 0x1c6   : > { %976 = vmatmul.mubr.msk.bf16.gmra.mxu0 %vm488_vm2, %v638_v15 }
 0x26e   : > { %v965_v17 = vpop.f32.mrf.mxu0 }
 0x26f   : > { %v724_v18 = vadd.f32 %v965_v17, %v879_v16 }
 0x270   : > { %v715_v19 = vpop.f32.mrf.mxu0 }
 0x271   : > { %780 = vst [vmem:[%s1112_s27 + $0x10] sm:$0xff] %v724_v18  ;;  %v716_v20 = vadd.f32 %v879_v16, %v715_v19 }
 0x272   : > { %v966_v21 = vpop.f32.mrf.mxu0 }
 0x273   : > { %778 = vst [vmem:[%s1112_s27] sm:$0xff] %v716_v20  ;;  %v727_v22 = vadd.f32 %v966_v21, %v879_v16 }
 0x274   : > { %v718_v23 = vpop.f32.mrf.mxu0 }
 0x275   : > { %781 = vst [vmem:[%s1112_s27 + $0x18] sm:$0xff] %v727_v22  ;;  %v719_v24 = vadd.f32 %v879_v16, %v718_v23 }
 0x276   : > { %v969_v25 = vpop.f32.mrf.mxu0 }
 0x277   : > { %779 = vst [vmem:[%s1112_s27 + $0x8] sm:$0xff] %v719_v24  ;;  %v740_v26 = vadd.f32 %v969_v25, %v879_v16 }
 0x278   : > { %v731_v27 = vpop.f32.mrf.mxu0 }
 0x279   : > { %784 = vst [vmem:[%s1112_s27 + $0x30] sm:$0xff] %v740_v26  ;;  %v732_v28 = vadd.f32 %v879_v16, %v731_v27 }
 0x27a   : > { %v970_v29 = vpop.f32.mrf.mxu0 }
 0x27b   : > { %782 = vst [vmem:[%s1112_s27 + $0x20] sm:$0xff] %v732_v28  ;;  %v743_v30 = vadd.f32 %v970_v29, %v879_v16 }
 0x27c   : > { %v734_v31 = vpop.f32.mrf.mxu0 }
 0x27d   : > { %785 = vst [vmem:[%s1112_s27 + $0x38] sm:$0xff] %v743_v30  ;;  %v735_v32 = vadd.f32 %v879_v16, %v734_v31 }
 0x27e   : > { %v973_v33 = vpop.f32.mrf.mxu0 }
 0x27f   : > { %783 = vst [vmem:[%s1112_s27 + $0x28] sm:$0xff] %v735_v32  ;;  %v756_v34 = vadd.f32 %v973_v33, %v879_v16 }
 0x280   : > { %v747_v35 = vpop.f32.mrf.mxu0 }
 0x281   : > { %788 = vst [vmem:[%s1112_s27 + $0x50] sm:$0xff] %v756_v34  ;;  %v748_v36 = vadd.f32 %v879_v16, %v747_v35 }
 0x282   : > { %v974_v37 = vpop.f32.mrf.mxu0 }
 0x283   : > { %786 = vst [vmem:[%s1112_s27 + $0x40] sm:$0xff] %v748_v36  ;;  %v759_v38 = vadd.f32 %v974_v37, %v879_v16 }
 0x284   : > { %v750_v39 = vpop.f32.mrf.mxu0 }
 0x285   : > { %789 = vst [vmem:[%s1112_s27 + $0x58] sm:$0xff] %v759_v38  ;;  %v751_v40 = vadd.f32 %v879_v16, %v750_v39 }
 0x286   : > { %v977_v41 = vpop.f32.mrf.mxu0 }
 0x287   : > { %787 = vst [vmem:[%s1112_s27 + $0x48] sm:$0xff] %v751_v40  ;;  %v772_v42 = vadd.f32 %v977_v41, %v879_v16 }
 0x288   : > { %v763_v43 = vpop.f32.mrf.mxu0 }
 0x289   : > { %792 = vst [vmem:[%s1112_s27 + $0x70] sm:$0xff] %v772_v42  ;;  %v764_v44 = vadd.f32 %v879_v16, %v763_v43 }
 0x28a   : > { %v978_v45 = vpop.f32.mrf.mxu0 }
 0x28b   : > { %790 = vst [vmem:[%s1112_s27 + $0x60] sm:$0xff] %v764_v44  ;;  %v775_v46 = vadd.f32 %v978_v45, %v879_v16 }
 0x28c   : > { %v766_v47 = vpop.f32.mrf.mxu0 }
 0x28d   : > { %793 = vst [vmem:[%s1112_s27 + $0x78] sm:$0xff] %v775_v46  ;;  %v767_v48 = vadd.f32 %v879_v16, %v766_v47 }
 0x28f   : > { %791 = vst [vmem:[%s1112_s27 + $0x68] sm:$0xff] %v767_v48 }
 0x290 PF: > { %s17_s24 = sadd.s32 1, %s1001_s24  }
 0x291   : > { %p14_p4 = scmp.ge.s32.totalorder %s17_s24, 4  }
 0x293   :  { %16 = sbr.rel (!%p14_p4) target bundleno = 1 (0x1), region = 78 }

</bundles_post_ra>
